<compile_context>
chip_gen: v7x
topology: tpu7x:2x2x1
jax: 0.10.0
libtpu: 0.0.40
codegen_flags: <defaults>
</compile_context>

<pallas_src>
import numpy as np

import jax
import jax.numpy as jnp
from jax.experimental import pallas as pl
from jax.experimental.pallas import tpu as pltpu

_MiB = 1024 * 1024
_R_SINGLE_BUFFER_BYTES = 4 * _MiB      # above this, single-buffer the R operand


def _nearest_index(dst_size: int, src_size: int) -> np.ndarray:
    # PyTorch F.interpolate(mode='nearest') index rule: floor(i * src / dst)
    return (np.arange(dst_size, dtype=np.int64) * src_size) // dst_size


def _vmem_capacity_bytes() -> int:
    """Physical VMEM of the current chip; conservative 64 MiB if unknown."""
    try:
        return int(pltpu.get_tpu_info().vmem_capacity_bytes)
    except Exception:
        return 64 * _MiB


def _pick_channel_tile(C: int, N: int, per_channel_bytes: int,
                       budget_bytes: int, itemsize: int,
                       uses_matmul: bool) -> int:
    """Largest dtype-aligned channel tile under the VMEM budget.

    With a cdiv grid the tile does NOT need to divide C (ragged tail is
    masked), but it must be a multiple of the sublane pack or equal C.
    """
    align = max(8, 32 // max(int(itemsize), 1))    # f32:8, bf16:16, int8:32
    if C <= align:
        return int(C)
    t = (budget_bytes // max(per_channel_bytes, 1)) // align * align
    t = int(max(align, min(t, C)))
    # MXU-friendly M dim when the one-hot matmul path is used.
    if uses_matmul and t >= 256:
        t = (t // 128) * 128
    # Make sure both v7x TensorCores get at least one grid step.
    if N == 1 and t >= C:
        half = -(-C // 2)
        half = -(-half // align) * align
        if half < C:
            t = half
    if t < C:
        t = max(align, (t // align) * align)
    return int(min(t, C))


def _make_cbfuse_kernel(src_has_r):
    """src_has_r[k] is True iff source k needs an upsample (has an R matrix)."""

    def kernel(*refs):
        i = 0
        tgt_ref = refs[i]; i += 1
        parsed = []
        for has_r in src_has_r:
            s_ref = refs[i]; i += 1
            r_ref = None
            if has_r:
                r_ref = refs[i]; i += 1
            parsed.append((s_ref, r_ref))
        out_ref = refs[i]

        # Value accumulator: out_ref is stored exactly once (no VMEM scratch).
        acc = tgt_ref[...].astype(jnp.float32)
        for s_ref, r_ref in parsed:
            s = s_ref[...]
            if r_ref is None:
                # same spatial resolution: plain elementwise add (VPU only)
                acc = acc + s.astype(jnp.float32)
            else:
                if not jnp.issubdtype(s.dtype, jnp.floating):
                    # TODO(synk): true gather-based non-MXU path for int8;
                    # for now cast to f32 (exact below 2^24), works on v7x too.
                    s = s.astype(jnp.float32)
                # nearest upsample as one fused one-hot selection matmul:
                # (TC, Hs*Ws) @ (Hs*Ws, Ht*Wt) -> (TC, Ht*Wt), f32 accumulate.
                acc = acc + jnp.dot(s, r_ref[...],
                                    preferred_element_type=jnp.float32)
        out_ref[...] = acc.astype(out_ref.dtype)

    return kernel


def cbfuse(x_list, index, mode="nearest"):
    """Pallas implementation of CBFuse.forward.

    x_list: [branch_feats_0, ..., branch_feats_{k-1}, target]
      - the first len(index) entries are lists of NCHW arrays; index[k] picks one
      - the last entry is the NCHW target tensor
    Returns the fused NCHW tensor with the target's shape/dtype.
    """
    assert mode == "nearest", "only nearest interpolation is implemented"
    # TODO(synk): other F.interpolate modes (bilinear, ...) are not implemented.
    target = x_list[-1]
    N, C, Ht, Wt = target.shape
    St = Ht * Wt
    # TODO(synk): for targets with Ht*Wt < 128, pack multiple channel rows per
    # lane row (or use a channels-last block) to avoid masked partial stores.
    srcs = [x[pick] for pick, x in zip(index, x_list)]
    tgt_bytes = jnp.dtype(target.dtype).itemsize

    # ---- static per-source metadata (one-hot selection matrices) -----------
    src_meta = []                       # (Ss, needs_r, r_np)
    r_total_resident = 0
    for s in srcs:
        Ns, Cs, Hs, Ws = s.shape
        assert Ns == N and Cs == C, "CBFuse sources must match target N and C"
        Ss = Hs * Ws
        if (Hs, Ws) == (Ht, Wt):
            src_meta.append((Ss, False, None))       # identity: skip the matmul
        else:
            ih = _nearest_index(Ht, Hs)               # (Ht,) static
            iw = _nearest_index(Wt, Ws)               # (Wt,) static
            src_flat = (ih[:, None] * Ws + iw[None, :]).reshape(-1)   # (St,)
            r_np = np.zeros((Ss, St), dtype=np.float32)
            r_np[src_flat, np.arange(St)] = 1.0
            src_meta.append((Ss, True, r_np))
            r_bytes = Ss * St * 2                     # bf16
            r_total_resident += (r_bytes if r_bytes > _R_SINGLE_BUFFER_BYTES
                                 else 2 * r_bytes)

    # ---- channel tile against a generation-aware VMEM budget ---------------
    uses_matmul = any(m[1] for m in src_meta)
    per_c = 2 * St * tgt_bytes                        # target block, 2x buffered
    per_c += 2 * St * tgt_bytes                       # output block, 2x buffered
    for s, (Ss, _, _) in zip(srcs, src_meta):
        per_c += 2 * Ss * jnp.dtype(s.dtype).itemsize
    cap = _vmem_capacity_bytes()
    tile_budget = max(4 * _MiB, min(cap // 2, 48 * _MiB) - r_total_resident)
    tc = _pick_channel_tile(C, N, per_c, tile_budget, tgt_bytes, uses_matmul)

    # ---- inputs / specs (spatial dims flattened onto the lane axis) --------
    inputs = [target.reshape(N, C, St)]
    in_specs = [pl.BlockSpec((None, tc, St), lambda n, c: (n, c, 0))]
    src_has_r = []
    for s, (Ss, needs_r, r_np) in zip(srcs, src_meta):
        inputs.append(s.reshape(N, C, Ss))
        in_specs.append(pl.BlockSpec((None, tc, Ss), lambda n, c: (n, c, 0)))
        src_has_r.append(needs_r)
        if needs_r:
            # bf16 one-hot is exact; halves R's HBM read and VMEM residency.
            inputs.append(jnp.asarray(r_np, dtype=jnp.bfloat16))
            r_bytes = Ss * St * 2
            if r_bytes > _R_SINGLE_BUFFER_BYTES:
                # constant block index => double-buffering buys nothing
                r_spec = pl.BlockSpec((Ss, St), lambda n, c: (0, 0),
                                      pipeline_mode=pl.Buffered(1))
            else:
                r_spec = pl.BlockSpec((Ss, St), lambda n, c: (0, 0))
            in_specs.append(r_spec)

    out_spec = pl.BlockSpec((None, tc, St), lambda n, c: (n, c, 0))
    kernel = _make_cbfuse_kernel(tuple(src_has_r))

    est_vmem = tc * per_c + r_total_resident
    vmem_limit = int(min(cap, max(est_vmem + 8 * _MiB, 32 * _MiB)))

    out = pl.pallas_call(
        kernel,
        out_shape=jax.ShapeDtypeStruct((N, C, St), target.dtype),
        grid=(N, pl.cdiv(C, tc)),                    # ragged channel tail OK
        in_specs=in_specs,
        out_specs=out_spec,
        compiler_params=pltpu.CompilerParams(
            dimension_semantics=("parallel", "parallel"),
            vmem_limit_bytes=vmem_limit),
    )(*inputs)
    return out.reshape(N, C, Ht, Wt)


def _cbfuse_reference(x_list, index):
    """Pure-JAX reference mirroring the PyTorch forward (nearest mode)."""
    target = x_list[-1]
    _, _, Ht, Wt = target.shape
    out = target.astype(jnp.float32)
    for pick, x in zip(index, x_list):
        s = x[pick].astype(jnp.float32)
        _, _, Hs, Ws = s.shape
        ih = _nearest_index(Ht, Hs)
        iw = _nearest_index(Wt, Ws)
        up = s[:, :, ih, :][:, :, :, iw]
        out = out + up
    return out.astype(target.dtype)


if __name__ == "__main__":
    key = jax.random.PRNGKey(0)
    k = jax.random.split(key, 7)
    N, C = 2, 4
    # CBFuse(index=[0, 1, 0]): three auxiliary branches followed by the target.
    # Exercises both upsampled sources (4x4 -> 16x16, 8x8 -> 16x16) and the
    # same-resolution skip path (16x16).
    x_list = [
        [jax.random.normal(k[0], (N, C, 4, 4), jnp.float32),
         jax.random.normal(k[1], (N, C, 8, 8), jnp.float32)],
        [jax.random.normal(k[2], (N, C, 4, 4), jnp.float32),
         jax.random.normal(k[3], (N, C, 8, 8), jnp.float32),
         jax.random.normal(k[4], (N, C, 16, 16), jnp.float32)],
        [jax.random.normal(k[5], (N, C, 16, 16), jnp.float32)],
        jax.random.normal(k[6], (N, C, 16, 16), jnp.float32),    # target
    ]
    index = [0, 1, 0]

    out = cbfuse(x_list, index)
    out = jax.block_until_ready(out)

    ref = _cbfuse_reference(x_list, index)
    assert out.shape == ref.shape and out.dtype == ref.dtype
    assert jnp.allclose(out, ref, atol=1e-5, rtol=1e-5), "kernel mismatch vs reference"
    print("KERNEL_OK")
</pallas_src>

<mosaic_0001>
module attributes {stable_mosaic.version = 11 : i64} {
  func.func @kernel(%arg0: i32, %arg1: i32, %arg2: memref<1x4x256xf32, #tpu.memory_space<vmem>>, %arg3: memref<1x4x16xf32, #tpu.memory_space<vmem>>, %arg4: memref<16x256xbf16, #tpu.memory_space<vmem>>, %arg5: memref<1x4x64xf32, #tpu.memory_space<vmem>>, %arg6: memref<64x256xbf16, #tpu.memory_space<vmem>>, %arg7: memref<1x4x256xf32, #tpu.memory_space<vmem>>, %arg8: memref<1x4x256xf32, #tpu.memory_space<vmem>>) attributes {dimension_semantics = [#tpu.dimension_semantics<parallel>, #tpu.dimension_semantics<parallel>], iteration_bounds = array<i64: 2, 1>, scalar_prefetch = 0 : i64, scratch_operands = 0 : i64, tpu.core_type = #tpu.core_type<tc>, window_params = [{transform_indices = @transform_0, window_bounds = array<i64: 1, 4, 256>}, {transform_indices = @transform_1, window_bounds = array<i64: 1, 4, 16>}, {pipeline_mode = #tpu.pipeline_mode<synchronous>, transform_indices = @transform_2, window_bounds = array<i64: 16, 256>}, {transform_indices = @transform_3, window_bounds = array<i64: 1, 4, 64>}, {pipeline_mode = #tpu.pipeline_mode<synchronous>, transform_indices = @transform_4, window_bounds = array<i64: 64, 256>}, {transform_indices = @transform_5, window_bounds = array<i64: 1, 4, 256>}, {transform_indices = @transform_6, window_bounds = array<i64: 1, 4, 256>}]} {
    %c0 = arith.constant 0 : index
    %c0_0 = arith.constant 0 : index
    %c0_1 = arith.constant 0 : index
    %0 = vector.load %arg2[%c0, %c0_0, %c0_1] : memref<1x4x256xf32, #tpu.memory_space<vmem>>, vector<1x4x256xf32>
    %1 = vector.shape_cast %0 : vector<1x4x256xf32> to vector<4x256xf32>
    %c0_2 = arith.constant 0 : index
    %c0_3 = arith.constant 0 : index
    %c0_4 = arith.constant 0 : index
    %2 = vector.load %arg3[%c0_2, %c0_3, %c0_4] : memref<1x4x16xf32, #tpu.memory_space<vmem>>, vector<1x4x16xf32>
    %3 = vector.shape_cast %2 : vector<1x4x16xf32> to vector<4x16xf32>
    %c0_5 = arith.constant 0 : index
    %c0_6 = arith.constant 0 : index
    %4 = vector.load %arg4[%c0_5, %c0_6] : memref<16x256xbf16, #tpu.memory_space<vmem>>, vector<16x256xbf16>
    %cst = arith.constant dense<0.000000e+00> : vector<4x256xf32>
    %5 = tpu.matmul %3, %4, %cst {dimension_numbers = #tpu.dot_dimension_numbers<[1], [0], [0], [1], [0, 0, 1, 1], [], []>} : vector<4x16xf32>, vector<16x256xbf16>, vector<4x256xf32> -> vector<4x256xf32>
    %6 = arith.addf %1, %5 : vector<4x256xf32>
    %c0_7 = arith.constant 0 : index
    %c0_8 = arith.constant 0 : index
    %c0_9 = arith.constant 0 : index
    %7 = vector.load %arg5[%c0_7, %c0_8, %c0_9] : memref<1x4x64xf32, #tpu.memory_space<vmem>>, vector<1x4x64xf32>
    %8 = vector.shape_cast %7 : vector<1x4x64xf32> to vector<4x64xf32>
    %c0_10 = arith.constant 0 : index
    %c0_11 = arith.constant 0 : index
    %9 = vector.load %arg6[%c0_10, %c0_11] : memref<64x256xbf16, #tpu.memory_space<vmem>>, vector<64x256xbf16>
    %cst_12 = arith.constant dense<0.000000e+00> : vector<4x256xf32>
    %10 = tpu.matmul %8, %9, %cst_12 {dimension_numbers = #tpu.dot_dimension_numbers<[1], [0], [0], [1], [0, 0, 1, 1], [], []>} : vector<4x64xf32>, vector<64x256xbf16>, vector<4x256xf32> -> vector<4x256xf32>
    %11 = arith.addf %6, %10 : vector<4x256xf32>
    %c0_13 = arith.constant 0 : index
    %c0_14 = arith.constant 0 : index
    %c0_15 = arith.constant 0 : index
    %12 = vector.load %arg7[%c0_13, %c0_14, %c0_15] : memref<1x4x256xf32, #tpu.memory_space<vmem>>, vector<1x4x256xf32>
    %13 = vector.shape_cast %12 : vector<1x4x256xf32> to vector<4x256xf32>
    %14 = arith.addf %11, %13 : vector<4x256xf32>
    %c0_16 = arith.constant 0 : index
    %c0_17 = arith.constant 0 : index
    %c0_18 = arith.constant 0 : index
    %15 = vector.load %arg8[%c0_16, %c0_17, %c0_18] : memref<1x4x256xf32, #tpu.memory_space<vmem>>, vector<1x4x256xf32>
    %16 = vector.shape_cast %15 : vector<1x4x256xf32> to vector<4x256xf32>
    %17 = vector.shape_cast %14 : vector<4x256xf32> to vector<1x4x256xf32>
    tpu.vector_store %arg8[%c0_16, %c0_17, %c0_18], %17 {strides = array<i32>} : memref<1x4x256xf32, #tpu.memory_space<vmem>>, vector<1x4x256xf32>,
    return
  }
  func.func @transform_0(%arg0: i32, %arg1: i32) -> (i32, i32, i32) {
    %c0_i32 = arith.constant 0 : i32
    %c0_i32_0 = arith.constant 0 : i32
    return %arg0, %arg1, %c0_i32 : i32, i32, i32
  }
  func.func @transform_1(%arg0: i32, %arg1: i32) -> (i32, i32, i32) {
    %c0_i32 = arith.constant 0 : i32
    %c0_i32_0 = arith.constant 0 : i32
    return %arg0, %arg1, %c0_i32 : i32, i32, i32
  }
  func.func @transform_2(%arg0: i32, %arg1: i32) -> (i32, i32) {
    %c0_i32 = arith.constant 0 : i32
    %c0_i32_0 = arith.constant 0 : i32
    %c0_i32_1 = arith.constant 0 : i32
    return %c0_i32, %c0_i32_0 : i32, i32
  }
  func.func @transform_3(%arg0: i32, %arg1: i32) -> (i32, i32, i32) {
    %c0_i32 = arith.constant 0 : i32
    %c0_i32_0 = arith.constant 0 : i32
    return %arg0, %arg1, %c0_i32 : i32, i32, i32
  }
  func.func @transform_4(%arg0: i32, %arg1: i32) -> (i32, i32) {
    %c0_i32 = arith.constant 0 : i32
    %c0_i32_0 = arith.constant 0 : i32
    %c0_i32_1 = arith.constant 0 : i32
    return %c0_i32, %c0_i32_0 : i32, i32
  }
  func.func @transform_5(%arg0: i32, %arg1: i32) -> (i32, i32, i32) {
    %c0_i32 = arith.constant 0 : i32
    %c0_i32_0 = arith.constant 0 : i32
    return %arg0, %arg1, %c0_i32 : i32, i32, i32
  }
  func.func @transform_6(%arg0: i32, %arg1: i32) -> (i32, i32, i32) {
    %c0_i32 = arith.constant 0 : i32
    %c0_i32_0 = arith.constant 0 : i32
    return %arg0, %arg1, %c0_i32 : i32, i32, i32
  }
}

</mosaic_0001>

<bundles_post_ra>
// kernel: tpu_custom_call.1
= control target key start
LH: loop header
LB: loop body
LE: loop exit
PB: predicated region body
PF: predicated region fallthrough
CT: control target
= control target key end

     0   :  { %s1562_s0 = inlined_call_operand.hbm [shape: f32[2,4,256], index: 0, kind: input, shape index: {}]   ;;  %s1563_s1 = inlined_call_operand.hbm [shape: f32[2,4,16], index: 1, kind: input, shape index: {}]   ;;  %s1564_s2 = inlined_call_operand.hbm [shape: bf16[16,256], index: 2, kind: input, shape index: {}]   ;;  %s1565_s3 = inlined_call_operand.hbm [shape: f32[2,4,64], index: 3, kind: input, shape index: {}]   ;;  %s1566_s4 = inlined_call_operand.hbm [shape: bf16[64,256], index: 4, kind: input, shape index: {}]   ;;  %s1567_s5 = inlined_call_operand.vmem [shape: f32[2,4,256], index: 5, kind: input, shape index: {}]   ;;  %s1568_s6 = inlined_call_operand.hbm [shape: f32[2,4,256], index: 6, kind: output, shape index: {}]  }
   0x1   :  { %1577 = sst [smem:[#allocation20_spill]] %s1562_s0 }
   0x2   :  { %1578 = sst [smem:[#allocation21_spill]] %s1564_s2 }
   0x3   :  { %1579 = sst [smem:[#allocation22_spill]] %s1566_s4 }
   0x4   :  { %11 = vsyncpa [#allocation3], 0 }
   0x5   :  { %13 = vsyncpa [#allocation3 + $0x1], 0 }
   0x6   :  { %14 = vsyncpa [#allocation6], 0 }
   0x7   :  { %16 = vsyncpa [#allocation6 + $0x1], 0 }
   0x8   :  { %17 = vsyncpa [#allocation9], 0 }
   0x9   :  { %19 = vsyncpa [#allocation9 + $0x1], 0 }
   0xa   :  { %20 = vsyncpa [#allocation4], 0 }
   0xb   :  { %22 = vsyncpa [#allocation4 + $0x1], 0  ;;  %s1222_s21 = smov 0   ;;  %s1224_s22 = smov 0  }
   0xc   :  { %s1226_s23 = smov 0   ;;  %s1228_s24 = smov 0  }
   0xd   :  { %s1230_s25 = smov 0   ;;  %s1232_s26 = smov 0  }
   0xe LB: > { %s1253_s27 = sadd.s32 4294967295, %s1176_s26   ;;  %s780_s28 = sadd.s32 4294967294, %s1176_s26   ;;  %s1176_s26 = sphi %s1232_s26, %s28_s26   ;;  %s1172_s25 = sphi %s1230_s25, %s1613_s25   ;;  %s1168_s24 = sphi %s1228_s24, %s1612_s24   ;;  %s1164_s23 = sphi %s1226_s23, %s1611_s23   ;;  %s1160_s22 = sphi %s1224_s22, %s1610_s22   ;;  %s1156_s21 = sphi %s1222_s21, %s1609_s21  }
   0xf   : > { %p62_p0 = scmp.ne.s32.totalorder %s1160_s22, %s1156_s21  ;;  %p1569_p1 = scmp.eq.s32.totalorder %s1253_s27, 0 }
  0x10   : > { %p220_p3 = scmp.eq.s32.totalorder %s780_s28, 1  ;;  %p781_p5 = scmp.ge.s32.totalorder %s1176_s26, 1 }
  0x11   : > { %p1262_p4 = por %p1569_p1, %p62_p0  ;;  %p227_p7 = scmp.lt.s32.totalorder %s1176_s26, 3 }
  0x12   : > { %p1267_p6 = por %p220_p3, %p62_p0  ;;  %s1178_s8 = smov [#allocation7]  }
  0x13   : > { %s1580_s29 = scalar_select %p1262_p4, 1, 0 }
  0x14   : > { %s1581_s30 = scalar_select %p1267_p6, 1, 0 }
  0x15   : > { %p1272_p8 = pnand %p781_p5, %p227_p7  ;;  %s239_s9 = sshll.u32 %s1178_s8, 4  ;;  %s1276_s9 = int_to_ptr.vmem [resolvable:$true] %s239_s9 }
  0x16   : > { %s1179_s11 = smov [#allocation10]   ;;  %s1584_s2 = sld [smem:[#allocation21_spill]] }
  0x17   : > { %s1582_s7 = scalar_select %p1272_p8, 1, 0 }
  0x18   : > { %p837_p9 = pneg %p1272_p8  ;;  %s252_s12 = sshll.u32 %s1179_s11, 4  ;;  %s1287_s12 = int_to_ptr.vmem [resolvable:$true] %s252_s12 }
  0x1a   : > { %p1283_p11 = pnand %p837_p9, %p1569_p1 }
  0x1c   : > { %s932_s15 = scalar_lea.hbm %s1584_s2, 256  ;;  %p934_p13 = pneg %p1283_p11 }
  0x1d   : > { %p933_p12 = scmp.ne.s32.totalorder %s1584_s2, %s932_s15  ;;  %p939_p5 = scmp.lt.u32.totalorder %s932_s15, %s1584_s2 }
  0x1f   : > { %p935_p0 = pnand %p934_p13, %p933_p12 }
  0x21   : > { %p936_p3 = pneg %p935_p0 }
  0x23   : > { %p941_p7 = pnand %p939_p5, %p936_p3 }
  0x25   : > { %944 = shalt.err (!%p941_p7)
}
  0x26   : > { %s945_s20 = scalar_lea.vmem %s1276_s9, 256  ;;  %p953_p2 = scmp.lt.s32.totalorder %s1276_s9, %s1276_s9 }
  0x27   : > { %p946_p9 = scmp.ne.s32.totalorder %s1276_s9, %s945_s20  ;;  %p954_p12 = scmp.lt.s32.totalorder %s945_s20, %s945_s20 }
  0x29   : > { %p948_p10 = pnand %p946_p9, %p934_p13  ;;  %p955_p0 = por %p954_p12, %p953_p2 }
  0x2b   : > { %p949_p1 = pneg %p948_p10 }
  0x2d   : > { %p956_p6 = pnand %p955_p0, %p949_p1 }
  0x2f   : > { %959 = shalt.err (!%p956_p6)
}
  0x30   : > { %s1180_s28 = smov 128   ;;  %s1181_s8 = smov 8  }
  0x31   : > { %840 = dma.hbm_to_vmem [thread:$0]  (!%p1283_p11), %s1584_s2, 256, %s1276_s9, [#allocation6], %s1180_s28, %s1180_s28, %s1181_s8  }
  0x32   : > { %s1585_s4 = sld [smem:[#allocation22_spill]] }
  0x38   : > { %s960_s16 = scalar_lea.hbm %s1585_s4, 1024 }
  0x39   : > { %p961_p2 = scmp.ne.s32.totalorder %s1585_s4, %s960_s16  ;;  %p967_p10 = scmp.lt.u32.totalorder %s960_s16, %s1585_s4 }
  0x3b   : > { %p963_p1 = pnand %p961_p2, %p934_p13 }
  0x3d   : > { %p964_p6 = pneg %p963_p1 }
  0x3f   : > { %p969_p3 = pnand %p967_p10, %p964_p6 }
  0x41   : > { %972 = shalt.err (!%p969_p3)
}
  0x42   : > { %s973_s9 = scalar_lea.vmem %s1287_s12, 1024  ;;  %p981_p12 = scmp.lt.s32.totalorder %s1287_s12, %s1287_s12 }
  0x43   : > { %p974_p5 = scmp.ne.s32.totalorder %s1287_s12, %s973_s9  ;;  %p982_p0 = scmp.lt.s32.totalorder %s973_s9, %s973_s9 }
  0x45   : > { %p976_p7 = pnand %p974_p5, %p934_p13  ;;  %p983_p2 = por %p982_p0, %p981_p12 }
  0x47   : > { %p977_p9 = pneg %p976_p7 }
  0x49   : > { %p984_p1 = pnand %p983_p2, %p977_p9 }
  0x4b   : > { %987 = shalt.err (!%p984_p1)
}
  0x4c   : > { %843 = dma.hbm_to_vmem [thread:$0]  (!%p1283_p11), %s1585_s4, 1024, %s1287_s12, [#allocation9], %s1180_s28, %s1180_s28, %s1181_s8  }
  0x4d   : > { %s40_s14 = sadd.s32 1, %s1172_s25  ;;  %s49_s15 = sadd.s32 1, %s1164_s23 }
  0x4e   : > { %p42_p13 = scmp.ge.s32.totalorder %s40_s14, 2  ;;  %p56_p6 = scmp.ne.s32.totalorder %s1164_s23, %s1160_s22 }
  0x4f   : > { %p57_p10 = scmp.eq.s32.totalorder %s1176_s26, 0  ;;  %p860_p3 = scmp.lt.s32.totalorder %s1176_s26, 2 }
  0x50   : > { %s1615_s14 = smov (%p42_p13, %s40_s14), 0  ;;  %p1587_p7 = scmp.eq.s32.totalorder %s1253_s27, 1 }
  0x51   : > { %1586 = sst [smem:[#allocation18_spill]] %s1615_s14  ;;  %p58_p5 = por %p57_p10, %p56_p6 }
  0x52   : > { %p1351_p9 = por %p1587_p7, %p56_p6  ;;  %s44_s16 = ssub.s32 %s1172_s25, %s1615_s14 }
  0x53   : > { %s1358_s17 = sand.u32 1, %s1164_s23   ;;  %p47_p11 = scmp.eq.s32.totalorder %s44_s16, 0 }
  0x54   : > { %s1588_s10 = scalar_select %p1351_p9, 1, 0 }
  0x55   : > { %s785_s12 = sshll.u32 %s1358_s17, 3  ;;  %s818_s28 = sshll.u32 %s1172_s25, 7 }
  0x56   : > { %s1363_s8 = scalar_select %p47_p11, %s1164_s23, %s49_s15  }
  0x57   : > { %s1590_s0 = sld [smem:[#allocation20_spill]]  ;;  %s270_s9 = scalar_lea.vmem [#allocation2], %s785_s12 }
  0x58   : > { %1589 = sst [smem:[#allocation19_spill]] %s1363_s8  ;;  %s280_s11 = sshll.u32 %s270_s9, 4  ;;  %s1376_s11 = int_to_ptr.vmem [resolvable:$true] %s280_s11 }
  0x59   : > { %p1372_p12 = pnand %p860_p3, %p58_p5  ;;  %s267_s16 = scalar_lea.sflag [#allocation3], %s1358_s17 }
  0x5b   : > { %s1591_s13 = scalar_select %p1372_p12, 1, 0 }
  0x5c   : > { %p1384_p2 = pneg %p1372_p12 }
  0x5d   : > { %s1368_s20 = scalar_lea.hbm %s1590_s0, %s818_s28  ;;  %s993_s19 = scalar_lea.hbm %s1590_s0, 256 }
  0x5e   : > { %s988_s2 = scalar_lea.hbm %s1368_s20, 128  ;;  %p994_p6 = scmp.lt.u32.totalorder %s1368_s20, %s1590_s0 }
  0x5f   : > { %p989_p0 = scmp.ne.s32.totalorder %s1368_s20, %s988_s2  ;;  %p995_p10 = scmp.lt.u32.totalorder %s993_s19, %s988_s2 }
  0x60   : > { %p997_p5 = scmp.lt.u32.totalorder %s988_s2, %s1368_s20 }
  0x61   : > { %p991_p1 = pnand %p1384_p2, %p989_p0  ;;  %p996_p3 = por %p995_p10, %p994_p6 }
  0x63   : > { %p992_p13 = pneg %p991_p1  ;;  %p998_p7 = por %p997_p5, %p996_p3 }
  0x65   : > { %p999_p11 = pnand %p998_p7, %p992_p13 }
  0x67   : > { %1002 = shalt.err (!%p999_p11)
}
  0x68   : > { %s1003_s15 = scalar_lea.vmem %s1376_s11, 128  ;;  %s1182_s12 = smov [#allocation2]  }
  0x69   : > { %p1004_p0 = scmp.ne.s32.totalorder %s1376_s11, %s1003_s15  ;;  %s1008_s18 = sshll.u32 %s1182_s12, 4  ;;  %s1009_s18 = int_to_ptr.vmem [resolvable:$false] %s1008_s18 }
  0x6a   : > { %s1010_s4 = scalar_lea.vmem %s1009_s18, 256  ;;  %p1011_p4 = scmp.lt.s32.totalorder %s1376_s11, %s1009_s18 }
  0x6b   : > { %p1006_p1 = pnand %p1004_p0, %p1384_p2  ;;  %p1012_p8 = scmp.lt.s32.totalorder %s1010_s4, %s1003_s15 }
  0x6d   : > { %p1007_p9 = pneg %p1006_p1  ;;  %p1013_p6 = por %p1012_p8, %p1011_p4 }
  0x6f   : > { %p1014_p10 = pnand %p1013_p6, %p1007_p9 }
  0x71   : > { %1017 = shalt.err (!%p1014_p10)
}
  0x72   : > { %847 = dma.hbm_to_vmem [thread:$0]  (!%p1372_p12), %s1368_s20, 128, %s1376_s11, %s267_s16  }
  0x73   : > { %s1574_s2 = sshll.u32 %s1358_s17, 2  ;;  %s789_s19 = sshll.u32 %s1172_s25, 6 }
  0x74   : > { %s1414_s15 = scalar_lea.hbm %s1563_s1, %s789_s19  ;;  %s291_s18 = scalar_lea.vmem [#allocation5], %s1574_s2 }
  0x75   : > { %s299_s4 = sshll.u32 %s291_s18, 4  ;;  %s1593_s0 = sand.u32 1, %s1176_s26   ;;  %s300_s4 = int_to_ptr.vmem [resolvable:$true] %s299_s4 }
  0x76   : > { %s288_s14 = scalar_lea.sflag [#allocation6], %s1593_s0  ;;  %s1018_s8 = scalar_lea.hbm %s1414_s15, 64 }
  0x77   : > { %p1019_p4 = scmp.ne.s32.totalorder %s1414_s15, %s1018_s8  ;;  %s1023_s16 = scalar_lea.hbm %s1563_s1, 128 }
  0x78   : > { %p1024_p13 = scmp.lt.u32.totalorder %s1414_s15, %s1563_s1  ;;  %p1025_p3 = scmp.lt.u32.totalorder %s1023_s16, %s1018_s8 }
  0x79   : > { %p1021_p8 = pnand %p1019_p4, %p1384_p2  ;;  %p1027_p7 = scmp.lt.u32.totalorder %s1018_s8, %s1414_s15 }
  0x7a   : > { %p1026_p5 = por %p1025_p3, %p1024_p13 }
  0x7b   : > { %p1022_p9 = pneg %p1021_p8 }
  0x7c   : > { %p1028_p11 = por %p1027_p7, %p1026_p5 }
  0x7e   : > { %p1029_p0 = pnand %p1028_p11, %p1022_p9 }
  0x80   : > { %1032 = shalt.err (!%p1029_p0)
}
  0x81   : > { %s1033_s0 = scalar_lea.vmem %s300_s4, 64  ;;  %s1183_s18 = smov [#allocation5]  }
  0x82   : > { %p1034_p1 = scmp.ne.s32.totalorder %s300_s4, %s1033_s0  ;;  %s1038_s2 = sshll.u32 %s1183_s18, 4  ;;  %s1039_s2 = int_to_ptr.vmem [resolvable:$false] %s1038_s2 }
  0x83   : > { %s1040_s20 = scalar_lea.vmem %s1039_s2, 128  ;;  %p1041_p4 = scmp.lt.s32.totalorder %s300_s4, %s1039_s2 }
  0x84   : > { %p1036_p6 = pnand %p1034_p1, %p1384_p2  ;;  %p1042_p8 = scmp.lt.s32.totalorder %s1040_s20, %s1033_s0 }
  0x86   : > { %p1037_p10 = pneg %p1036_p6  ;;  %p1043_p12 = por %p1042_p8, %p1041_p4 }
  0x88   : > { %p1044_p3 = pnand %p1043_p12, %p1037_p10 }
  0x8a   : > { %1047 = shalt.err (!%p1044_p3)
}
  0x8b   : > { %p1594_p13 = scmp.ne.s32.totalorder %s1591_s13, 0  ;;  %s1442_s16 = scalar_lea.hbm %s1565_s3, %s789_s19 }
  0x8c   : > { %s1595_s9 = sshll.u32 %s1358_s17, 2  ;;  %s1596_s0 = sand.u32 1, %s1176_s26  }
  0x8d   : > { %850 = dma.hbm_to_vmem [thread:$0]  (!%p1594_p13), %s1414_s15, 64, %s300_s4, %s288_s14  }
  0x8e   : > { %s310_s2 = scalar_lea.vmem [#allocation8], %s1595_s9  ;;  %s307_s18 = scalar_lea.sflag [#allocation9], %s1596_s0 }
  0x8f   : > { %s318_s12 = sshll.u32 %s310_s2, 4  ;;  %s1048_s20 = scalar_lea.hbm %s1442_s16, 64  ;;  %s319_s12 = int_to_ptr.vmem [resolvable:$true] %s318_s12 }
  0x90   : > { %p1049_p12 = scmp.ne.s32.totalorder %s1442_s16, %s1048_s20  ;;  %s1053_s19 = scalar_lea.hbm %s1565_s3, 128 }
  0x91   : > { %p1054_p7 = scmp.lt.u32.totalorder %s1442_s16, %s1565_s3  ;;  %p1055_p11 = scmp.lt.u32.totalorder %s1053_s19, %s1048_s20 }
  0x92   : > { %p1051_p9 = pnand %p1049_p12, %p1384_p2  ;;  %p1057_p1 = scmp.lt.u32.totalorder %s1048_s20, %s1442_s16 }
  0x93   : > { %p1056_p0 = por %p1055_p11, %p1054_p7 }
  0x94   : > { %p1052_p5 = pneg %p1051_p9 }
  0x95   : > { %p1058_p6 = por %p1057_p1, %p1056_p0 }
  0x97   : > { %p1059_p10 = pnand %p1058_p6, %p1052_p5 }
  0x99   : > { %1062 = shalt.err (!%p1059_p10)
}
  0x9a   : > { %s1063_s8 = scalar_lea.vmem %s319_s12, 64  ;;  %s1184_s11 = smov [#allocation8]  }
  0x9b   : > { %p1064_p4 = scmp.ne.s32.totalorder %s319_s12, %s1063_s8  ;;  %s1068_s9 = sshll.u32 %s1184_s11, 4  ;;  %s1069_s9 = int_to_ptr.vmem [resolvable:$false] %s1068_s9 }
  0x9c   : > { %s1070_s2 = scalar_lea.vmem %s1069_s9, 128  ;;  %p1071_p12 = scmp.lt.s32.totalorder %s319_s12, %s1069_s9 }
  0x9d   : > { %p1066_p8 = pnand %p1064_p4, %p1384_p2  ;;  %p1072_p9 = scmp.lt.s32.totalorder %s1070_s2, %s1063_s8 }
  0x9f   : > { %p1067_p3 = pneg %p1066_p8  ;;  %p1073_p13 = por %p1072_p9, %p1071_p12 }
  0xa1   : > { %p1074_p7 = pnand %p1073_p13, %p1067_p3 }
  0xa3   : > { %1077 = shalt.err (!%p1074_p7)
}
  0xa4   : > { %p1597_p11 = scmp.ne.s32.totalorder %s1591_s13, 0  ;;  %p1598_p5 = scmp.ne.s32.totalorder %s1582_s7, 0 }
  0xa5   : > { %s1468_s28 = sand.u32 (!%p1598_p5), 1, %s1160_s22   ;;  %p1599_p2 = scmp.ne.s32.totalorder (!%p1598_p5), %s1580_s29, 0 }
  0xa6   : > { %853 = dma.hbm_to_vmem [thread:$0]  (!%p1597_p11), %s1442_s16, 64, %s319_s12, %s307_s18  }
  0xa7   : > { %339 = sbr.rel (%p1598_p5) target bundleno = 438 (0x1b6), region = 44  ;;  %s793_s0 = sshll.u32 (!%p1598_p5), %s1468_s28, 3 }
  0xa8   : > { %s342_s20 = scalar_lea.sflag (!%p1598_p5), [#allocation3], %s1468_s28  ;;  %s1474_s14 = scalar_lea.vmem (!%p1598_p5), [#allocation2], %s793_s0 }
  0xae   : > { %1131 = dma.done.wait (%p1599_p2), %s342_s20, 128  }
  0xaf   : > { %1133 = vsyncadd (%p1599_p2), %s342_s20, 4294967168  ;;  %s350_s7 = sand.u32 1, %s1253_s27   ;;  %s794_s13 = sshll.u32 %s1468_s28, 2 }
  0xb0   : > { %s351_s16 = scalar_lea.sflag [#allocation6], %s350_s7  ;;  %s354_s12 = scalar_lea.vmem [#allocation5], %s794_s13 }
  0xb1   : > { %1135 = dma.done.wait (%p1599_p2), %s351_s16, 64  }
  0xb2   : > { %1137 = vsyncadd (%p1599_p2), %s351_s16, 4294967232  ;;  %p1600_p13 = scmp.eq.s32.totalorder %s1253_s27, 0 }
  0xb4   : > { %1139 = dma.done.wait (%p1600_p13), [#allocation6], 256   ;;  %p1601_p0 = pmov %p1600_p13 }
  0xb5   : > { %s364_s18 = scalar_lea.sflag [#allocation9], %s350_s7  ;;  %s1490_s15 = scalar_lea.vmem [#allocation8], %s794_s13 }
  0xb6   : > { %1141 = vsyncadd (%p1601_p0), [#allocation6], 4294967040 }
  0xb7   : > { %1143 = dma.done.wait (%p1599_p2), %s364_s18, 64  }
  0xb8   : > { %1145 = vsyncadd (%p1599_p2), %s364_s18, 4294967232  ;;  %p1602_p1 = pmov %p1601_p0 }
  0xb9   : > { %p1603_p6 = pmov %p1601_p0 }
  0xba   : > { %1147 = dma.done.wait (%p1602_p1), [#allocation9], 1024  }
  0xbb   : > { %1149 = vsyncadd (%p1603_p6), [#allocation9], 4294966272  ;;  %v1185_v0 = vmov 0.0   ;;  %v917_v1 = vld [vmem:[#allocation10 + $0x4] ss:$8 sps:$4 sm:$0xff]   ;;  %vm443_vm0 = vcmask 130048  }
  0xbc   : > { %479 = vmatprep.mubr.f32.mxu0 %v1185_v0  ;;  %576 = vmatprep.mubr.f32.mxu1 %v1185_v0  ;;  %v919_v2 = vld [vmem:[#allocation10] ss:$8 sps:$4 sm:$0xff]   ;;  %v920_v3 = vld [vmem:[#allocation10 + $0x14] ss:$8 sps:$4 sm:$0xff]   ;;  %v922_v4 = vld [vmem:[#allocation10 + $0x10] ss:$8 sps:$4 sm:$0xff]  }
  0xbd   : > { %544 = vmatprep.subr.bf16.mxu1 %v917_v1  ;;  %v923_v5 = vld [vmem:[#allocation10 + $0x24] ss:$8 sps:$4 sm:$0xff]   ;;  %v928_v7 = vld [vmem:[#allocation7] ss:$8 sps:$4 sm:$0xff]   ;;  %v929_v10 = vld [vmem:[#allocation10 + $0x34] ss:$8 sps:$4 sm:$0xff]  }
  0xbe   : > { %545 = vmatpush1.bf16.msra.mxu1 %v919_v2  ;;  %v925_v6 = vld [vmem:[#allocation7 + $0x4] ss:$8 sps:$4 sm:$0xff]   ;;  %v927_v8 = vld [vmem:[#allocation10 + $0x20] ss:$8 sps:$4 sm:$0xff]   ;;  %v931_v11 = vld [vmem:[#allocation10 + $0x30] ss:$8 sps:$4 sm:$0xff]  }
  0xbf   : > { %546 = vmatprep.subr.bf16.mxu1 %v920_v3  ;;  %447 = vmatprep.subr.bf16.mxu0 %v925_v6  ;;  %v430_v9 = vld [vmem:[%s354_s12] sm:$0xf]  ;;  %v491_v12 = vld [vmem:[%s1490_s15] sm:$0xf]  ;;  %vm540_vm1 = vcmask 523264   ;;  %p419_p10 = scmp.lt.s32.totalorder %s1168_s24, 1 }
  0xc0   : > { %448 = vmatpush1.bf16.msra.mxu0 %v928_v7  ;;  %v429_v16 = vld [vmem:[%s1474_s14] sm:$0xff]  ;;  %s820_s8 = sshll.u32 %s1168_s24, 7  ;;  %s418_s11 = scalar_lea.vmem [#allocation11], %s793_s0 }
  0xc1   : > { %s420_s27 = scalar_select %p419_p10, %s1168_s24, 1 }
  0xc2   : > { %547 = vmatpush1.bf16.msra.mxu1 %v922_v4  ;;  %s608_s9 = sshll.u32 %s418_s11, 4  ;;  %s1513_s14 = scalar_lea.hbm %s1568_s6, %s820_s8  ;;  %s1515_s9 = int_to_ptr.vmem [resolvable:$true] %s608_s9 }
  0xc3   : > { %548 = vmatprep.subr.bf16.mxu1 %v923_v5  ;;  %803 = vmatmul.mubr.msk.f32.vlgmr.msra.gmra.mrb[0].mxu0 %vm443_vm0, %v430_v9  ;;  %s819_s29 = sshll.u32 %s420_s27, 3  ;;  %s592_s7 = scalar_lea.sflag [#allocation4], %s1468_s28 }
  0xc4   : > { %s427_s17 = scalar_lea.vmem %s1567_s5, %s819_s29  ;;  %s1078_s13 = scalar_lea.vmem %s1515_s9, 128 }
  0xc5   : > { %v588_v21 = vld [vmem:[%s427_s17] sm:$0xff]  ;;  %p1079_p4 = scmp.ne.s32.totalorder %s1515_s9, %s1078_s13  ;;  %p1604_p8 = scmp.ne.s32.totalorder %s1588_s10, 0 }
  0xc6   : > { %549 = vmatpush1.bf16.msra.mxu1 %v927_v8  ;;  %s1186_s24 = smov [#allocation11]  }
  0xc7   : > { %550 = vmatprep.subr.bf16.mxu1 %v929_v10  ;;  %p1080_p3 = pnand %p1079_p4, %p1604_p8  ;;  %s1082_s0 = sshll.u32 %s1186_s24, 4  ;;  %s1083_s0 = int_to_ptr.vmem [resolvable:$false] %s1082_s0 }
  0xc8   : > { %s1084_s16 = scalar_lea.vmem %s1083_s0, 256  ;;  %p1085_p9 = scmp.lt.s32.totalorder %s1515_s9, %s1083_s0 }
  0xc9   : > { %p1081_p12 = pneg %p1080_p3  ;;  %p1086_p7 = scmp.lt.s32.totalorder %s1084_s16, %s1078_s13 }
  0xca   : > { %551 = vmatpush1.bf16.msra.mxu1 %v931_v11 }
  0xcb   : > { %p1087_p11 = por %p1086_p7, %p1085_p9 }
  0xcd   : > { %812 = vmatmul.mubr.msk.f32.vlgmr.msra.gmra.mrb[0].mxu1 %vm540_vm1, %v491_v12  ;;  %p1088_p5 = pnand %p1087_p11, %p1081_p12 }
 0x196   : > { %v481_v13 = vpop.f32.mrb[0].mxu0 }
 0x197   : > { %v483_v14 = vpop.f32.mrb[1].mxu0 }
 0x198   : > { %v488_v15 = vcombine.low %v481_v13, %v483_v14 }
 0x19a   : > { %v490_v17 = vadd.f32 %v488_v15, %v429_v16 }
 0x1a0   : > { %v578_v18 = vpop.f32.mrb[0].mxu1 }
 0x1a1   : > { %v580_v19 = vpop.f32.mrb[1].mxu1 }
 0x1a2   : > { %v585_v20 = vcombine.low %v578_v18, %v580_v19 }
 0x1a4   : > { %v587_v22 = vadd.f32 %v585_v20, %v490_v17 }
 0x1a6   : > { %v589_v23 = vadd.f32 %v588_v21, %v587_v22 }
 0x1a8   : > { %590 = vst [vmem:[%s418_s11] sm:$0xff] %v589_v23 }
 0x1a9   : > { %1091 = shalt.err (!%p1088_p5)
}
 0x1aa   : > { %s1092_s28 = scalar_lea.hbm %s1513_s14, 128  ;;  %s1096_s15 = scalar_lea.hbm %s1568_s6, 256 }
 0x1ab   : > { %p1093_p2 = scmp.ne.s32.totalorder %s1513_s14, %s1092_s28  ;;  %p1097_p1 = scmp.lt.u32.totalorder %s1513_s14, %s1568_s6 }
 0x1ac   : > { %p1098_p6 = scmp.lt.u32.totalorder %s1096_s15, %s1092_s28  ;;  %p1100_p4 = scmp.lt.u32.totalorder %s1092_s28, %s1513_s14 }
 0x1ad   : > { %p1094_p13 = pnand %p1093_p2, %p1604_p8 }
 0x1ae   : > { %p1099_p10 = por %p1098_p6, %p1097_p1 }
 0x1af   : > { %p1095_p0 = pneg %p1094_p13 }
 0x1b0   : > { %p1101_p3 = por %p1100_p4, %p1099_p10 }
 0x1b2   : > { %p1102_p12 = pnand %p1101_p3, %p1095_p0 }
 0x1b4   : > { %1105 = shalt.err (!%p1102_p12)
}
 0x1b5   : > { %835 = dma.vmem_to_hbm [thread:$0]  (%p1604_p8), %s1515_s9, 128, %s1513_s14, %s592_s7  }
 0x1b6 PF: > { %s620_s19 = sand.u32 1, %s1156_s21   ;;  %p1605_p9 = scmp.ne.s32.totalorder %s1581_s30, 0 }
 0x1b7   : > { %p1606_p7 = scmp.ge.s32.totalorder %s1176_s26, 2  ;;  %s621_s4 = scalar_lea.sflag [#allocation4], %s620_s19 }
 0x1b9   : > { %p855_p11 = pnand %p1606_p7, %p1605_p9 }
 0x1bb   : > { %1151 = dma.done.wait (!%p855_p11), %s621_s4, 128  }
 0x1bc   : > { %1153 = vsyncadd (!%p855_p11), %s621_s4, 4294967168  ;;  %s28_s26 = sadd.s32 1, %s1176_s26   ;;  %s1607_s10 = sld [smem:[#allocation19_spill]] }
 0x1bd   : > { %p25_p5 = scmp.ge.s32.totalorder %s28_s26, 4   ;;  %s1608_s17 = sld [smem:[#allocation18_spill]] }
 0x1be   : > { %s1609_s21 = smov %s1160_s22  ;;  %s1610_s22 = smov %s1164_s23 }
 0x1bf   : > { %s1612_s24 = smov %s1172_s25  ;;  %27 = sbr.rel (!%p25_p5) target bundleno = 14 (0xe), region = 126 }
 0x1c2   : > { %s1611_s23 = smov %s1607_s10 }
 0x1c3   : > { %s1613_s25 = smov %s1608_s17 }
 0x1c6   :  { %626 = vsyncpa [#allocation3], 1 }
 0x1c7   :  { %628 = vsyncpa [#allocation3 + $0x1], 1 }
 0x1c8   :  { %629 = vsyncpa [#allocation6], 1 }
 0x1c9   :  { %631 = vsyncpa [#allocation6 + $0x1], 1 }
 0x1ca   :  { %632 = vsyncpa [#allocation9], 1 }
 0x1cb   :  { %634 = vsyncpa [#allocation9 + $0x1], 1 }
 0x1cc   :  { %635 = vsyncpa [#allocation4], 1 }
 0x1cd   :  { %637 = vsyncpa [#allocation4 + $0x1], 1 }

</bundles_post_ra>
